<compile_context>
chip_gen: v5e
topology: v5e:2x2
jax: 0.10.0
libtpu: 0.0.40
codegen_flags: <defaults>
</compile_context>

<pallas_src>
import functools

import jax
import jax.numpy as jnp
import numpy as np
from jax.experimental import pallas as pl
from jax.experimental.pallas import tpu as pltpu


# ----------------------------- Pallas kernel -----------------------------
def critic_mlp_kernel(xT_ref, w1_ref, b1_ref, w2_ref, b2_ref, w3_ref, b3_ref, out_ref,
                      *, epilogue_dtype):
    # xT : (state_dim, TM)   batch on the lane axis, already in compute dtype
    # w1 : (128, state_dim)  compute dtype      b1: (128, 1) epilogue dtype
    # w2 : (128, 128)        compute dtype      b2: (128, 1) epilogue dtype
    # w3 : (128, 1)          epilogue dtype     b3: (1, 1) f32 scalar in SMEM
    # out: (1, TM)           lane-dense value row (f32)
    xT = xT_ref[...]

    # layer 1: h1^T = relu(W1 @ x^T + b1)                      (128, TM)
    h1 = jnp.dot(w1_ref[...], xT, preferred_element_type=jnp.float32)
    h1 = jnp.maximum(h1.astype(epilogue_dtype) + b1_ref[...], 0)
    h1 = h1.astype(w2_ref.dtype)                               # no-op when epilogue==compute

    # layer 2: h2^T = relu(W2 @ h1^T + b2)                     (128, TM)
    h2 = jnp.dot(w2_ref[...], h1, preferred_element_type=jnp.float32)
    h2 = jnp.maximum(h2.astype(epilogue_dtype) + b2_ref[...], 0)

    # value head (128 -> 1): VPU multiply + XLU sublane reduction, f32 accumulation.
    # TODO(synk): on v7x (VALU-bound, idle MXU) this could be a skinny (1,128)@(128,TM) dot.
    head = (h2 * w3_ref[...]).astype(jnp.float32)              # (128, TM)
    v = jnp.sum(head, axis=0, keepdims=True) + b3_ref[0, 0]    # (1, TM)
    out_ref[...] = v.astype(out_ref.dtype)


def _round_up(x, m):
    return ((x + m - 1) // m) * m


def _default_epilogue_dtype(compute_dtype):
    if compute_dtype == jnp.float32:
        return jnp.float32
    try:
        kind = jax.devices()[0].device_kind.lower()
    except Exception:
        kind = ""
    # v5e has no bf16 VPU -> keep the elementwise epilogue in f32 there.
    if "v5" in kind:
        return jnp.float32
    return compute_dtype


def critic_forward(state, params, *, block_batch=4096,
                   compute_dtype=jnp.bfloat16, epilogue_dtype=None):
    """state: (B, state_dim) float32 -> value: (B, 1) float32."""
    w1, b1, w2, b2, w3, b3 = params
    B, state_dim = state.shape
    hidden = w1.shape[0]  # 128

    if epilogue_dtype is None:
        epilogue_dtype = _default_epilogue_dtype(compute_dtype)

    # Lane-aligned batch tile; aim for >= 2 tiles so v7x megacore gets both cores busy.
    tm_cap = max(128, _round_up(block_batch, 128))
    tm = max(128, min(tm_cap, _round_up(pl.cdiv(B, 2), 128)))
    b_pad = _round_up(B, tm)
    num_tiles = b_pad // tm

    # Feature-major input, padded, cast ONCE to compute dtype (halves DMA bytes for bf16).
    xT = jnp.pad(state.T, ((0, 0), (0, b_pad - B))).astype(compute_dtype)

    # Weights in compute dtype; biases / head vector in epilogue dtype (VMEM-resident).
    w1c = w1.astype(compute_dtype)
    w2c = w2.astype(compute_dtype)
    b1c = b1.astype(epilogue_dtype)
    b2c = b2.astype(epilogue_dtype)
    w3c = w3.astype(epilogue_dtype)
    b3c = b3.astype(jnp.float32)                               # scalar via SMEM

    flops = 2 * b_pad * (state_dim * hidden + hidden * hidden + hidden)
    bytes_accessed = (xT.size * xT.dtype.itemsize
                      + w1c.size * w1c.dtype.itemsize + w2c.size * w2c.dtype.itemsize
                      + b1c.size * b1c.dtype.itemsize + b2c.size * b2c.dtype.itemsize
                      + w3c.size * w3c.dtype.itemsize
                      + 4 * (1 + b_pad))

    out = pl.pallas_call(
        functools.partial(critic_mlp_kernel, epilogue_dtype=epilogue_dtype),
        out_shape=jax.ShapeDtypeStruct((1, b_pad), jnp.float32),
        grid=(num_tiles,),
        in_specs=[
            pl.BlockSpec((state_dim, tm), lambda i: (0, i)),        # x tiles stream
            pl.BlockSpec((hidden, state_dim), lambda i: (0, 0)),    # weights stay resident
            pl.BlockSpec((hidden, 1), lambda i: (0, 0)),
            pl.BlockSpec((hidden, hidden), lambda i: (0, 0)),
            pl.BlockSpec((hidden, 1), lambda i: (0, 0)),
            pl.BlockSpec((hidden, 1), lambda i: (0, 0)),
            pl.BlockSpec(memory_space=pltpu.MemorySpace.SMEM),      # b3 scalar
        ],
        out_specs=pl.BlockSpec((1, tm), lambda i: (0, i)),          # lane-dense output row
        compiler_params=pltpu.CompilerParams(
            dimension_semantics=("parallel",),                      # megacore sharding on v7x
        ),
        cost_estimate=pl.CostEstimate(
            flops=flops, transcendentals=0, bytes_accessed=bytes_accessed),
    )(xT, w1c, b1c, w2c, b2c, w3c, b3c)

    return out[0, :B].reshape(B, 1)


# ------------------------- deterministic parameter init -------------------------
def orthogonal_(key, shape, gain):
    """Mimic torch.nn.init.orthogonal_ for a 2D (out_features, in_features) weight."""
    rows, cols = shape
    flat_shape = (rows, cols) if rows >= cols else (cols, rows)
    a = jax.random.normal(key, flat_shape, dtype=jnp.float32)
    q, r = jnp.linalg.qr(a)
    d = jnp.sign(jnp.diagonal(r))
    d = jnp.where(d == 0, 1.0, d)
    q = q * d[None, :]
    if rows < cols:
        q = q.T
    return gain * q                  # (out_features, in_features) — PyTorch layout


def init_critic_params(state_dim, key, hidden=128):
    k1, k2, k3 = jax.random.split(key, 3)
    gain = float(np.sqrt(2.0))
    w1 = orthogonal_(k1, (hidden, state_dim), gain)        # (128, state_dim)
    b1 = jnp.zeros((hidden, 1), dtype=jnp.float32)         # feature-major column
    w2 = orthogonal_(k2, (hidden, hidden), gain)           # (128, 128)
    b2 = jnp.zeros((hidden, 1), dtype=jnp.float32)
    w3 = orthogonal_(k3, (1, hidden), gain).T              # stored as (128, 1) column
    b3 = jnp.zeros((1, 1), dtype=jnp.float32)
    return (w1, b1, w2, b2, w3, b3)


# ----------------------------------- main -----------------------------------
if __name__ == "__main__":
    key = jax.random.PRNGKey(0)
    k_param, k_state = jax.random.split(key)

    state_dim = 8
    params = init_critic_params(state_dim, k_param)

    def ref_forward(s):
        # PyTorch semantics: x @ W.T + b, ReLU between layers.
        w1, b1, w2, b2, w3, b3 = params
        h = jnp.maximum(s @ w1.T + b1.T, 0.0)
        h = jnp.maximum(h @ w2.T + b2.T, 0.0)
        return h @ w3 + b3

    # 1) small batch, bf16 default (fast path) — relaxed tolerance for bf16 matmuls.
    state_small = jax.random.normal(k_state, (2, state_dim), dtype=jnp.float32)
    critic_bf16 = jax.jit(critic_forward)
    v_bf16 = jax.block_until_ready(critic_bf16(state_small, params))
    assert v_bf16.shape == (2, 1)
    np.testing.assert_allclose(np.asarray(v_bf16), np.asarray(ref_forward(state_small)),
                               rtol=5e-2, atol=5e-2)

    # 2) f32 compute path — tight tolerance validates exact module semantics.
    critic_f32 = jax.jit(functools.partial(critic_forward, compute_dtype=jnp.float32))
    v_f32 = jax.block_until_ready(critic_f32(state_small, params))
    np.testing.assert_allclose(np.asarray(v_f32), np.asarray(ref_forward(state_small)),
                               rtol=1e-4, atol=1e-5)

    # 3) multi-tile batch (exercises grid > 1, padding, megacore-friendly tiling).
    state_big = jax.random.normal(jax.random.PRNGKey(1), (260, state_dim), dtype=jnp.float32)
    v_big = jax.block_until_ready(critic_bf16(state_big, params))
    assert v_big.shape == (260, 1)
    np.testing.assert_allclose(np.asarray(v_big), np.asarray(ref_forward(state_big)),
                               rtol=5e-2, atol=5e-2)

    print("KERNEL_OK")
</pallas_src>

<mosaic_0001>
module attributes {stable_mosaic.version = 11 : i64} {
  func.func @critic_mlp_kernel(%arg0: i32, %arg1: memref<8x128xbf16, #tpu.memory_space<vmem>>, %arg2: memref<128x8xbf16, #tpu.memory_space<vmem>>, %arg3: memref<128x1xbf16, #tpu.memory_space<vmem>>, %arg4: memref<128x128xbf16, #tpu.memory_space<vmem>>, %arg5: memref<128x1xbf16, #tpu.memory_space<vmem>>, %arg6: memref<128x1xbf16, #tpu.memory_space<vmem>>, %arg7: memref<1x1xf32, #tpu.memory_space<smem>>, %arg8: memref<1x128xf32, #tpu.memory_space<vmem>>) attributes {dimension_semantics = [#tpu.dimension_semantics<parallel>], iteration_bounds = array<i64: 1>, scalar_prefetch = 0 : i64, scratch_operands = 0 : i64, tpu.core_type = #tpu.core_type<tc>, window_params = [{transform_indices = @transform_0, window_bounds = array<i64: 8, 128>}, {pipeline_mode = #tpu.pipeline_mode<synchronous>, transform_indices = @transform_1, window_bounds = array<i64: 128, 8>}, {pipeline_mode = #tpu.pipeline_mode<synchronous>, transform_indices = @transform_2, window_bounds = array<i64: 128, 1>}, {pipeline_mode = #tpu.pipeline_mode<synchronous>, transform_indices = @transform_3, window_bounds = array<i64: 128, 128>}, {pipeline_mode = #tpu.pipeline_mode<synchronous>, transform_indices = @transform_4, window_bounds = array<i64: 128, 1>}, {pipeline_mode = #tpu.pipeline_mode<synchronous>, transform_indices = @transform_5, window_bounds = array<i64: 128, 1>}, {transform_indices = @transform_6, window_bounds = array<i64: 1, 1>}, {transform_indices = @transform_7, window_bounds = array<i64: 1, 128>}]} {
    %c0 = arith.constant 0 : index
    %c0_0 = arith.constant 0 : index
    %0 = vector.load %arg1[%c0, %c0_0] : memref<8x128xbf16, #tpu.memory_space<vmem>>, vector<8x128xbf16>
    %c0_1 = arith.constant 0 : index
    %c0_2 = arith.constant 0 : index
    %1 = vector.load %arg2[%c0_1, %c0_2] : memref<128x8xbf16, #tpu.memory_space<vmem>>, vector<128x8xbf16>
    %cst = arith.constant dense<0.000000e+00> : vector<128x128xf32>
    %2 = tpu.matmul %1, %0, %cst {dimension_numbers = #tpu.dot_dimension_numbers<[1], [0], [0], [1], [0, 0, 1, 1], [], []>} : vector<128x8xbf16>, vector<8x128xbf16>, vector<128x128xf32> -> vector<128x128xf32>
    %3 = arith.truncf %2 : vector<128x128xf32> to vector<128x128xbf16>
    %c0_3 = arith.constant 0 : index
    %c0_4 = arith.constant 0 : index
    %4 = vector.load %arg3[%c0_3, %c0_4] : memref<128x1xbf16, #tpu.memory_space<vmem>>, vector<128x1xbf16>
    %5 = vector.broadcast %4 : vector<128x1xbf16> to vector<128x128xbf16>
    %6 = arith.addf %3, %5 : vector<128x128xbf16>
    %cst_5 = arith.constant 0.000000e+00 : bf16
    %7 = vector.broadcast %cst_5 : bf16 to vector<128x128xbf16>
    %8 = arith.maximumf %6, %7 : vector<128x128xbf16>
    %c0_6 = arith.constant 0 : index
    %c0_7 = arith.constant 0 : index
    %9 = vector.load %arg4[%c0_6, %c0_7] : memref<128x128xbf16, #tpu.memory_space<vmem>>, vector<128x128xbf16>
    %cst_8 = arith.constant dense<0.000000e+00> : vector<128x128xf32>
    %10 = tpu.matmul %9, %8, %cst_8 {dimension_numbers = #tpu.dot_dimension_numbers<[1], [0], [0], [1], [0, 0, 1, 1], [], []>} : vector<128x128xbf16>, vector<128x128xbf16>, vector<128x128xf32> -> vector<128x128xf32>
    %11 = arith.truncf %10 : vector<128x128xf32> to vector<128x128xbf16>
    %c0_9 = arith.constant 0 : index
    %c0_10 = arith.constant 0 : index
    %12 = vector.load %arg5[%c0_9, %c0_10] : memref<128x1xbf16, #tpu.memory_space<vmem>>, vector<128x1xbf16>
    %13 = vector.broadcast %12 : vector<128x1xbf16> to vector<128x128xbf16>
    %14 = arith.addf %11, %13 : vector<128x128xbf16>
    %cst_11 = arith.constant 0.000000e+00 : bf16
    %15 = vector.broadcast %cst_11 : bf16 to vector<128x128xbf16>
    %16 = arith.maximumf %14, %15 : vector<128x128xbf16>
    %c0_12 = arith.constant 0 : index
    %c0_13 = arith.constant 0 : index
    %17 = vector.load %arg6[%c0_12, %c0_13] : memref<128x1xbf16, #tpu.memory_space<vmem>>, vector<128x1xbf16>
    %18 = vector.broadcast %17 : vector<128x1xbf16> to vector<128x128xbf16>
    %19 = arith.mulf %16, %18 : vector<128x128xbf16>
    %20 = arith.extf %19 : vector<128x128xbf16> to vector<128x128xf32>
    %cst_14 = arith.constant dense<0.000000e+00> : vector<128xf32>
    %21 = vector.multi_reduction <add>, %20, %cst_14 [0] : vector<128x128xf32> to vector<128xf32>
    %22 = vector.shape_cast %21 : vector<128xf32> to vector<1x128xf32>
    %c0_15 = arith.constant 0 : index
    %c0_16 = arith.constant 0 : index
    %23 = memref.load %arg7[%c0_15, %c0_16] : memref<1x1xf32, #tpu.memory_space<smem>>
    %24 = vector.broadcast %23 : f32 to vector<1x128xf32>
    %25 = arith.addf %22, %24 : vector<1x128xf32>
    %c0_17 = arith.constant 0 : index
    %c0_18 = arith.constant 0 : index
    %26 = vector.load %arg8[%c0_17, %c0_18] : memref<1x128xf32, #tpu.memory_space<vmem>>, vector<1x128xf32>
    tpu.vector_store %arg8[%c0_17, %c0_18], %25 {strides = array<i32>} : memref<1x128xf32, #tpu.memory_space<vmem>>, vector<1x128xf32>,
    return
  }
  func.func @transform_0(%arg0: i32) -> (i32, i32) {
    %c0_i32 = arith.constant 0 : i32
    %c0_i32_0 = arith.constant 0 : i32
    return %c0_i32, %arg0 : i32, i32
  }
  func.func @transform_1(%arg0: i32) -> (i32, i32) {
    %c0_i32 = arith.constant 0 : i32
    %c0_i32_0 = arith.constant 0 : i32
    %c0_i32_1 = arith.constant 0 : i32
    return %c0_i32, %c0_i32_0 : i32, i32
  }
  func.func @transform_2(%arg0: i32) -> (i32, i32) {
    %c0_i32 = arith.constant 0 : i32
    %c0_i32_0 = arith.constant 0 : i32
    %c0_i32_1 = arith.constant 0 : i32
    return %c0_i32, %c0_i32_0 : i32, i32
  }
  func.func @transform_3(%arg0: i32) -> (i32, i32) {
    %c0_i32 = arith.constant 0 : i32
    %c0_i32_0 = arith.constant 0 : i32
    %c0_i32_1 = arith.constant 0 : i32
    return %c0_i32, %c0_i32_0 : i32, i32
  }
  func.func @transform_4(%arg0: i32) -> (i32, i32) {
    %c0_i32 = arith.constant 0 : i32
    %c0_i32_0 = arith.constant 0 : i32
    %c0_i32_1 = arith.constant 0 : i32
    return %c0_i32, %c0_i32_0 : i32, i32
  }
  func.func @transform_5(%arg0: i32) -> (i32, i32) {
    %c0_i32 = arith.constant 0 : i32
    %c0_i32_0 = arith.constant 0 : i32
    %c0_i32_1 = arith.constant 0 : i32
    return %c0_i32, %c0_i32_0 : i32, i32
  }
  func.func @transform_6(%arg0: i32) -> (i32, i32) {
    %c0_i32 = arith.constant 0 : i32
    %c0_i32_0 = arith.constant 0 : i32
    %c0_i32_1 = arith.constant 0 : i32
    return %c0_i32, %c0_i32_0 : i32, i32
  }
  func.func @transform_7(%arg0: i32) -> (i32, i32) {
    %c0_i32 = arith.constant 0 : i32
    %c0_i32_0 = arith.constant 0 : i32
    return %c0_i32, %arg0 : i32, i32
  }
}

</mosaic_0001>

<bundles_post_ra>
// kernel: critic_forward.1
= control target key start
LH: loop header
LB: loop body
LE: loop exit
PB: predicated region body
PF: predicated region fallthrough
CT: control target
= control target key end

     0   :  { %vm110_vm0 = vcmask 1043456   ;;  %v1207_v0 = vmov 0   ;;  %vm85_vm1 = vcmask 64512   ;;  %s1635_s2 = inlined_call_operand.vmem [shape: bf16[128,1], index: 2, kind: input, shape index: {}]   ;;  %s1636_s0 = inlined_call_operand.vmem [shape: bf16[8,128], index: 0, kind: input, shape index: {}]   ;;  %s1637_s1 = inlined_call_operand.vmem [shape: bf16[128,8], index: 1, kind: input, shape index: {}]   ;;  %s1638_s4 = inlined_call_operand.vmem [shape: bf16[128,1], index: 4, kind: input, shape index: {}]   ;;  %s1639_s5 = inlined_call_operand.vmem [shape: bf16[128,1], index: 5, kind: input, shape index: {}]   ;;  %s1640_s3 = inlined_call_operand.vmem [shape: bf16[128,128], index: 3, kind: input, shape index: {}]   ;;  %s1641_s6 = inlined_call_operand.<no memory space> [shape: f32[1,1], index: 6, kind: input, shape index: {}]   ;;  %s1642_s7 = inlined_call_operand.vmem [shape: f32[1,128], index: 7, kind: output, shape index: {}]  }
   0x1   :  { %1206 = vset.pattern.permute.xlu2 %v1207_v0  ;;  %1205 = vset.pattern.permute.xlu1 %v1207_v0  ;;  %v193_v1 = vld [vmem:[%s1635_s2 + $0x38] sm:$0xf]  ;;  %v191_v2 = vld [vmem:[%s1635_s2 + $0x30] sm:$0xf]  ;;  %v189_v3 = vld [vmem:[%s1635_s2 + $0x28] sm:$0xf] }
   0x2   :  { %1204 = vset.pattern.permute.xlu0 %v1207_v0  ;;  %305 = vperm.xlu1 %1205, %v191_v2   ;;  %v28_v4 = vld [vmem:[%s1636_s0] sm:$0xf]  ;;  %v1182_v7 = vld [vmem:[%s1637_s1 + $0x28] sm:$0xff]  ;;  %v192_v8 = vld [vmem:[%s1635_s2 + $0x34] sm:$0xf] }
   0x3   :  { %323 = vperm.xlu0 %1204, %v193_v1   ;;  %287 = vperm.xlu2 %1206, %v189_v3   ;;  %v112_v5 = vsel %vm110_vm0, %v28_v4, 0  ;;  %v1177_v6 = vld [vmem:[%s1637_s1] sm:$0xff]  ;;  %v194_v9 = vld [vmem:[%s1635_s2 + $0x3c] sm:$0xf]  ;;  %v190_v10 = vld [vmem:[%s1635_s2 + $0x2c] sm:$0xf] }
   0x4   :  { %121 = vmatpush.bf16.msra.mxu0 %v112_v5  ;;  %1193 = vmatpush.bf16.msra.mxu3 %v112_v5  ;;  %v188_v11 = vld [vmem:[%s1635_s2 + $0x24] sm:$0xf]  ;;  %v187_v12 = vld [vmem:[%s1635_s2 + $0x20] sm:$0xf]  ;;  %v185_v13 = vld [vmem:[%s1635_s2 + $0x18] sm:$0xf] }
   0x5   :  { %v1178_v14 = vld [vmem:[%s1637_s1 + $0x8] sm:$0xff]  ;;  %v1183_v15 = vld [vmem:[%s1637_s1 + $0x30] sm:$0xff]  ;;  %v186_v17 = vld [vmem:[%s1635_s2 + $0x1c] sm:$0xf] }
   0x6   :  { %v183_v16 = vld [vmem:[%s1635_s2 + $0x10] sm:$0xf]  ;;  %v184_v18 = vld [vmem:[%s1635_s2 + $0x14] sm:$0xf]  ;;  %v182_v19 = vld [vmem:[%s1635_s2 + $0xc] sm:$0xf] }
   0x7   :  { %1137 = vmatmul.msk.bf16.vlgmr.msra.gmra.mxu0 %vm85_vm1, %v1177_v6  ;;  %1142 = vmatmul.msk.bf16.vlgmr.msra.gmra.mxu3 %vm85_vm1, %v1182_v7  ;;  %v181_v20 = vld [vmem:[%s1635_s2 + $0x8] sm:$0xf]  ;;  %v179_v21 = vld [vmem:[%s1635_s2] sm:$0xf]  ;;  %v1179_v22 = vld [vmem:[%s1637_s1 + $0x10] sm:$0xff] }
   0x8   :  { %v1184_v23 = vld [vmem:[%s1637_s1 + $0x38] sm:$0xff]  ;;  %v572_v24 = vld [vmem:[%s1638_s4] sm:$0xf]  ;;  %v180_v25 = vld [vmem:[%s1635_s2 + $0x4] sm:$0xf] }
   0x9   :  { %v573_v26 = vld [vmem:[%s1638_s4 + $0x4] sm:$0xf]  ;;  %v575_v27 = vld [vmem:[%s1638_s4 + $0xc] sm:$0xf]  ;;  %v574_v28 = vld [vmem:[%s1638_s4 + $0x8] sm:$0xf] }
   0xa   :  { %314 = vperm.xlu1 %1205, %v192_v8   ;;  %v576_v29 = vld [vmem:[%s1638_s4 + $0x10] sm:$0xf]  ;;  %v1180_v30 = vld [vmem:[%s1637_s1 + $0x18] sm:$0xff]  ;;  %v577_v32 = vld [vmem:[%s1638_s4 + $0x14] sm:$0xf] }
   0xb   :  { %332 = vperm.xlu0 %1204, %v194_v9   ;;  %296 = vperm.xlu2 %1206, %v190_v10   ;;  %v578_v31 = vld [vmem:[%s1638_s4 + $0x18] sm:$0xf]  ;;  %v579_v33 = vld [vmem:[%s1638_s4 + $0x1c] sm:$0xf]  ;;  %v581_v34 = vld [vmem:[%s1638_s4 + $0x24] sm:$0xf] }
   0xc   :  { %v580_v35 = vld [vmem:[%s1638_s4 + $0x20] sm:$0xf]  ;;  %v582_v36 = vld [vmem:[%s1638_s4 + $0x28] sm:$0xf]  ;;  %v584_v38 = vld [vmem:[%s1638_s4 + $0x30] sm:$0xf] }
   0xd   :  { %v1181_v37 = vld [vmem:[%s1637_s1 + $0x20] sm:$0xff]  ;;  %v583_v39 = vld [vmem:[%s1638_s4 + $0x2c] sm:$0xf]  ;;  %v585_v40 = vld [vmem:[%s1638_s4 + $0x34] sm:$0xf] }
   0xe   :  { %v587_v41 = vld [vmem:[%s1638_s4 + $0x3c] sm:$0xf]  ;;  %v586_v42 = vld [vmem:[%s1638_s4 + $0x38] sm:$0xf]  ;;  %v844_v43 = vld [vmem:[%s1639_s5] sm:$0xf] }
   0xf   :  { %v846_v44 = vld [vmem:[%s1639_s5 + $0x8] sm:$0xf]  ;;  %v845_v45 = vld [vmem:[%s1639_s5 + $0x4] sm:$0xf]  ;;  %v847_v46 = vld [vmem:[%s1639_s5 + $0xc] sm:$0xf] }
  0x10   :  { %v849_v47 = vld [vmem:[%s1639_s5 + $0x14] sm:$0xf]  ;;  %v848_v48 = vld [vmem:[%s1639_s5 + $0x10] sm:$0xf]  ;;  %v850_v49 = vld [vmem:[%s1639_s5 + $0x18] sm:$0xf] }
  0x11   :  { %v852_v50 = vld [vmem:[%s1639_s5 + $0x20] sm:$0xf]  ;;  %v851_v51 = vld [vmem:[%s1639_s5 + $0x1c] sm:$0xf]  ;;  %v853_v52 = vld [vmem:[%s1639_s5 + $0x24] sm:$0xf] }
  0x12   :  { %278 = vperm.xlu1 %1205, %v188_v11   ;;  %v855_v54 = vld [vmem:[%s1639_s5 + $0x2c] sm:$0xf]  ;;  %v854_v55 = vld [vmem:[%s1639_s5 + $0x28] sm:$0xf]  ;;  %v856_v56 = vld [vmem:[%s1639_s5 + $0x30] sm:$0xf] }
  0x13   :  { %269 = vperm.xlu0 %1204, %v187_v12   ;;  %251 = vperm.xlu2 %1206, %v185_v13   ;;  %v858_v58 = vld [vmem:[%s1639_s5 + $0x38] sm:$0xf]  ;;  %v857_v59 = vld [vmem:[%s1639_s5 + $0x34] sm:$0xf]  ;;  %v859_v60 = vld [vmem:[%s1639_s5 + $0x3c] sm:$0xf] }
  0x14   :  { %v1208_v6 = vmov 839922192  }
  0x15   :  { %v201_v7 = vunpack.c.l.s4 %v1208_v6 }
  0x17   :  { %1138 = vmatmul.msk.bf16.gmra.mxu0 %vm85_vm1, %v1178_v14  ;;  %1143 = vmatmul.msk.bf16.gmra.mxu3 %vm85_vm1, %v1183_v15  ;;  %v1440_v9 = vunpack.c.0.s8 %v201_v7 }
  0x1a   :  { %233 = vperm.xlu1 %1205, %v183_v16  }
  0x1b   :  { %260 = vperm.xlu0 %1204, %v186_v17   ;;  %242 = vperm.xlu2 %1206, %v184_v18  }
  0x22   :  { %224 = vperm.xlu1 %1205, %v182_v19  }
  0x23   :  { %215 = vperm.xlu0 %1204, %v181_v20   ;;  %197 = vperm.xlu2 %1206, %v179_v21  }
  0x27   :  { %1139 = vmatmul.msk.bf16.gmra.mxu0 %vm85_vm1, %v1179_v22  ;;  %1144 = vmatmul.msk.bf16.gmra.mxu3 %vm85_vm1, %v1184_v23 }
  0x2a   :  { %590 = vperm.xlu1 %1205, %v572_v24  }
  0x2b   :  { %206 = vperm.xlu0 %1204, %v180_v25   ;;  %599 = vperm.xlu2 %1206, %v573_v26  }
  0x32   :  { %617 = vperm.xlu1 %1205, %v575_v27  }
  0x33   :  { %608 = vperm.xlu0 %1204, %v574_v28   ;;  %626 = vperm.xlu2 %1206, %v576_v29  }
  0x37   :  { %1140 = vmatmul.msk.bf16.gmra.mxu0 %vm85_vm1, %v1180_v30 }
  0x3a   :  { %644 = vperm.xlu1 %1205, %v578_v31  }
  0x3b   :  { %635 = vperm.xlu0 %1204, %v577_v32   ;;  %653 = vperm.xlu2 %1206, %v579_v33  }
  0x42   :  { %671 = vperm.xlu1 %1205, %v581_v34  }
  0x43   :  { %662 = vperm.xlu0 %1204, %v580_v35   ;;  %680 = vperm.xlu2 %1206, %v582_v36  }
  0x47   :  { %1141 = vmatmul.msk.bf16.gmra.mxu0 %vm85_vm1, %v1181_v37 }
  0x4a   :  { %698 = vperm.xlu1 %1205, %v584_v38  }
  0x4b   :  { %689 = vperm.xlu0 %1204, %v583_v39   ;;  %707 = vperm.xlu2 %1206, %v585_v40  }
  0x52   :  { %725 = vperm.xlu1 %1205, %v587_v41  }
  0x53   :  { %716 = vperm.xlu0 %1204, %v586_v42   ;;  %862 = vperm.xlu2 %1206, %v844_v43  }
  0x5a   :  { %880 = vperm.xlu1 %1205, %v846_v44  }
  0x5b   :  { %871 = vperm.xlu0 %1204, %v845_v45   ;;  %889 = vperm.xlu2 %1206, %v847_v46  }
  0x5d   :  { %v1410_v53 = vpop.permute.xlu2 %287 }
  0x5e   :  { %v293_v44 = vperm.slane %v1410_v53, %v1440_v9 }
  0x62   :  { %907 = vperm.xlu1 %1205, %v849_v47  }
  0x63   :  { %898 = vperm.xlu0 %1204, %v848_v48   ;;  %916 = vperm.xlu2 %1206, %v850_v49  }
  0x65   :  { %v1430_v61 = vpop.permute.xlu2 %296 }
  0x66   :  { %v302_v45 = vperm.slane %v1430_v61, %v1440_v9 }
  0x6a   :  { %934 = vperm.xlu1 %1205, %v852_v50  }
  0x6b   :  { %925 = vperm.xlu0 %1204, %v851_v51   ;;  %943 = vperm.xlu2 %1206, %v853_v52  }
  0x6d   :  { %v1432_v63 = vpop.permute.xlu2 %251 }
  0x72   :  { %961 = vperm.xlu1 %1205, %v855_v54  }
  0x73   :  { %952 = vperm.xlu0 %1204, %v854_v55   ;;  %970 = vperm.xlu2 %1206, %v856_v56  }
  0x74   :  { %v306_v27 = vpop.permute.xlu1 %305 }
  0x75   :  { %v324_v57 = vpop.permute.xlu0 %323  ;;  %v1436_v4 = vpop.permute.xlu2 %242  ;;  %v311_v36 = vperm.slane %v306_v27, %v1440_v9  ;;  %v257_v27 = vperm.slane %v1432_v63, %v1440_v9 }
  0x76   :  { %v329_v33 = vperm.slane %v324_v57, %v1440_v9 }
  0x77   :  { %v367_v46 = vunpack.c.l.bf16 %v311_v36 }
  0x78   :  { %v369_v40 = vunpack.c.l.bf16 %v329_v33 }
  0x7a   :  { %988 = vperm.xlu1 %1205, %v858_v58  }
  0x7b   :  { %979 = vperm.xlu0 %1204, %v857_v59   ;;  %997 = vperm.xlu2 %1206, %v859_v60   ;;  %v365_v59 = vunpack.c.l.bf16 %v293_v44  ;;  %v366_v60 = vunpack.c.l.bf16 %v302_v45 }
  0x7c   :  { %v315_v37 = vpop.permute.xlu1 %314 }
  0x7d   :  { %v333_v62 = vpop.permute.xlu0 %332  ;;  %v198_v12 = vpop.permute.xlu2 %197  ;;  %v320_v39 = vperm.slane %v315_v37, %v1440_v9 }
  0x7e   :  { %v203_v13 = vperm.slane %v198_v12, %v1440_v9  ;;  %v338_v38 = vperm.slane %v333_v62, %v1440_v9 }
  0x7f   :  { %v368_v48 = vunpack.c.l.bf16 %v320_v39 }
  0x80   :  { %v355_v16 = vunpack.c.l.bf16 %v203_v13  ;;  %v370_v47 = vunpack.c.l.bf16 %v338_v38 }
  0x84   :  { %v123_v0 = vpop.f32.mrf.mxu0  ;;  %v279_v13 = vpop.permute.xlu1 %278 }
  0x85   :  { %v1434_v1 = vpop.permute.xlu0 %269  ;;  %v163_v14 = vpack.c.bf16 %v123_v0, %v123_v0 }
  0x87   :  { %v339_v17 = vunpack.c.l.bf16 %v163_v14 }
  0x89   :  { %v371_v22 = vadd.f32 %v355_v16, %v339_v17 }
  0x8a   :  { %v148_v2 = vpop.f32.mrf.mxu3 }
  0x8b   :  { %v419_v29 = vmax.f32 %v371_v22, 0.0  ;;  %v173_v49 = vpack.c.bf16 %v148_v2, %v148_v2 }
  0x8c   :  { %v125_v3 = vpop.f32.mrf.mxu0 }
  0x8d   :  { %v1438_v5 = vpop.permute.xlu0 %260  ;;  %v164_v18 = vpack.c.bf16 %v125_v3, %v125_v3  ;;  %v349_v62 = vunpack.c.l.bf16 %v173_v49 }
  0x8f   :  { %v340_v23 = vunpack.c.l.bf16 %v164_v18  ;;  %v381_v12 = vadd.f32 %v365_v59, %v349_v62 }
  0x91   :  { %v429_v18 = vmax.f32 %v381_v12, 0.0 }
  0x92   :  { %v150_v8 = vpop.f32.mrf.mxu3 }
  0x93   :  { %v174_v50 = vpack.c.bf16 %v150_v8, %v150_v8 }
  0x94   :  { %v1442_v10 = vpop.f32.mrf.mxu0 }
  0x95   :  { %v1444_v11 = vpop.permute.xlu0 %215  ;;  %v350_v0 = vunpack.c.l.bf16 %v174_v50 }
  0x97   :  { %v382_v2 = vadd.f32 %v366_v60, %v350_v0 }
  0x9a   :  { %v153_v15 = vpop.f32.mrf.mxu3 }
  0x9b   :  { %v175_v41 = vpack.c.bf16 %v153_v15, %v153_v15 }
  0x9c   :  { %v1447_v19 = vpop.f32.mrf.mxu0 }
  0x9d   :  { %v207_v20 = vpop.permute.xlu0 %206  ;;  %v351_v52 = vunpack.c.l.bf16 %v175_v41 }
  0x9e   :  { %v212_v21 = vperm.slane %v207_v20, %v1440_v9  ;;  %v430_v20 = vmax.f32 %v382_v2, 0.0 }
  0x9f   :  { %v383_v53 = vadd.f32 %v367_v46, %v351_v52  ;;  %v165_v52 = vpack.c.bf16 %v1442_v10, %v1442_v10 }
  0xa0   :  { %v356_v24 = vunpack.c.l.bf16 %v212_v21  ;;  %v440_v21 = vpack.c.bf16 %v430_v20, %v429_v18  ;;  %v1190_v18 = vld [vmem:[%s1640_s3 + $0x28] sm:$0xff]  ;;  %v1187_v20 = vld [vmem:[%s1640_s3 + $0x10] sm:$0xff] }
  0xa1   :  { %v431_v14 = vmax.f32 %v383_v53, 0.0 }
  0xa2   :  { %v372_v25 = vadd.f32 %v356_v24, %v340_v23  ;;  %v155_v26 = vpop.f32.mrf.mxu3  ;;  %v234_v23 = vpop.permute.xlu1 %233 }
  0xa3   :  { %v176_v42 = vpack.c.bf16 %v155_v26, %v155_v26 }
  0xa4   :  { %v1450_v28 = vpop.f32.mrf.mxu0  ;;  %v420_v30 = vmax.f32 %v372_v25, 0.0  ;;  %v275_v25 = vperm.slane %v1434_v1, %v1440_v9 }
  0xa5   :  { %v352_v54 = vunpack.c.l.bf16 %v176_v42  ;;  %v239_v42 = vperm.slane %v234_v23, %v1440_v9  ;;  %v600_v23 = vpop.permute.xlu2 %599 }
  0xa6   :  { %v1452_v31 = vpack.c.bf16 %v420_v30, %v419_v29  ;;  %v284_v29 = vperm.slane %v279_v13, %v1440_v9  ;;  %v266_v30 = vperm.slane %v1438_v5, %v1440_v9  ;;  %v363_v37 = vunpack.c.l.bf16 %v275_v25 }
  0xa7   :  { %v384_v3 = vadd.f32 %v368_v48, %v352_v54  ;;  %v167_v5 = vpack.c.bf16 %v1450_v28, %v1450_v28  ;;  %v221_v54 = vperm.slane %v1444_v11, %v1440_v9 }
  0xa8   :  { %v364_v41 = vunpack.c.l.bf16 %v284_v29  ;;  %v362_v63 = vunpack.c.l.bf16 %v266_v30 }
  0xa9   :  { %v432_v15 = vmax.f32 %v384_v3, 0.0  ;;  %v343_v28 = vunpack.c.l.bf16 %v167_v5  ;;  %v357_v53 = vunpack.c.l.bf16 %v221_v54 }
  0xaa   :  { %v158_v32 = vpop.f32.mrf.mxu3 }
  0xab   :  { %v177_v34 = vpack.c.bf16 %v158_v32, %v158_v32  ;;  %v441_v17 = vpack.c.bf16 %v432_v15, %v431_v14  ;;  %v1185_v15 = vld [vmem:[%s1640_s3] sm:$0xff] }
  0xac   :  { %v1455_v35 = vpop.f32.mrf.mxu0 }
  0xad   :  { %v353_v43 = vunpack.c.l.bf16 %v177_v34  ;;  %v248_v34 = vperm.slane %v1436_v4, %v1440_v9  ;;  %v168_v38 = vpack.c.bf16 %v1455_v35, %v1455_v35  ;;  %v166_v35 = vpack.c.bf16 %v1447_v19, %v1447_v19 }
  0xae   :  { %v341_v19 = vunpack.c.l.bf16 %v165_v52 }
  0xaf   :  { %v385_v55 = vadd.f32 %v369_v40, %v353_v43  ;;  %v361_v40 = vunpack.c.l.bf16 %v257_v27  ;;  %v225_v43 = vpop.permute.xlu1 %224  ;;  %v360_v4 = vunpack.c.l.bf16 %v248_v34  ;;  %v344_v48 = vunpack.c.l.bf16 %v168_v38 }
  0xb0   :  { %v342_v59 = vunpack.c.l.bf16 %v166_v35  ;;  %v373_v12 = vadd.f32 %v357_v53, %v341_v19  ;;  %v605_v35 = vperm.slane %v600_v23, %v1440_v9 }
  0xb1   :  { %v433_v61 = vmax.f32 %v385_v55, 0.0  ;;  %v376_v60 = vadd.f32 %v360_v4, %v344_v48 }
  0xb2   :  { %v160_v51 = vpop.f32.mrf.mxu3 }
  0xb3   :  { %v178_v56 = vpack.c.bf16 %v160_v51, %v160_v51  ;;  %v359_v51 = vunpack.c.l.bf16 %v239_v42 }
  0xb4   :  { %v138_v57 = vpop.f32.mrf.mxu0 }
  0xb5   :  { %v354_v58 = vunpack.c.l.bf16 %v178_v56  ;;  %v169_v32 = vpack.c.bf16 %v138_v57, %v138_v57  ;;  %v375_v3 = vadd.f32 %v359_v51, %v343_v28 }
  0xb7   :  { %v386_v6 = vadd.f32 %v370_v47, %v354_v58  ;;  %v345_v44 = vunpack.c.l.bf16 %v169_v32  ;;  %v230_v47 = vperm.slane %v225_v43, %v1440_v9  ;;  %v423_v11 = vmax.f32 %v375_v3, 0.0  ;;  %v591_v25 = vpop.permute.xlu1 %590 }
  0xb8   :  { %v596_v51 = vperm.slane %v591_v25, %v1440_v9 }
  0xb9   :  { %v434_v7 = vmax.f32 %v386_v6, 0.0  ;;  %v377_v55 = vadd.f32 %v361_v40, %v345_v44  ;;  %v358_v58 = vunpack.c.l.bf16 %v230_v47 }
  0xba   :  { %v748_v19 = vunpack.c.l.bf16 %v596_v51 }
  0xbb   :  { %v442_v8 = vpack.c.bf16 %v434_v7, %v433_v61  ;;  %v425_v6 = vmax.f32 %v377_v55, 0.0  ;;  %v374_v61 = vadd.f32 %v358_v58, %v342_v59  ;;  %v424_v7 = vmax.f32 %v376_v60, 0.0 }
  0xbc   :  { %v140_v16 = vpop.f32.mrf.mxu0 }
  0xbd   :  { %507 = vmatpush.bf16.msra.mxu1 %v442_v8  ;;  %1194 = vmatpush.bf16.msra.mxu2 %v442_v8  ;;  %v170_v26 = vpack.c.bf16 %v140_v16, %v140_v16  ;;  %v437_v13 = vpack.c.bf16 %v424_v7, %v423_v11  ;;  %v422_v2 = vmax.f32 %v374_v61, 0.0  ;;  %v421_v8 = vmax.f32 %v373_v12, 0.0  ;;  %v1189_v16 = vld [vmem:[%s1640_s3 + $0x20] sm:$0xff] }
  0xbf   :  { %v346_v1 = vunpack.c.l.bf16 %v170_v26  ;;  %v436_v14 = vpack.c.bf16 %v422_v2, %v421_v8  ;;  %v609_v26 = vpop.permute.xlu0 %608  ;;  %v618_v29 = vpop.permute.xlu1 %617 }
  0xc0   :  { %v623_v54 = vperm.slane %v618_v29, %v1440_v9  ;;  %v614_v58 = vperm.slane %v609_v26, %v1440_v9 }
  0xc1   :  { %508 = vmatpush.bf16.msra.mxu1 %v441_v17  ;;  %1195 = vmatpush.bf16.msra.mxu2 %v441_v17  ;;  %v378_v49 = vadd.f32 %v362_v63, %v346_v1  ;;  %v1186_v17 = vld [vmem:[%s1640_s3 + $0x8] sm:$0xff] }
  0xc2   :  { %v750_v2 = vunpack.c.l.bf16 %v614_v58 }
  0xc3   :  { %v426_v0 = vmax.f32 %v378_v49, 0.0 }
  0xc4   :  { %v143_v22 = vpop.f32.mrf.mxu0 }
  0xc5   :  { %509 = vmatpush.bf16.msra.mxu1 %v440_v21  ;;  %1196 = vmatpush.bf16.msra.mxu2 %v440_v21  ;;  %v171_v24 = vpack.c.bf16 %v143_v22, %v143_v22  ;;  %v438_v10 = vpack.c.bf16 %v426_v0, %v425_v6  ;;  %v1188_v21 = vld [vmem:[%s1640_s3 + $0x18] sm:$0xff] }
  0xc6   :  { %v1192_v22 = vld [vmem:[%s1640_s3 + $0x38] sm:$0xff] }
  0xc7   :  { %v347_v33 = vunpack.c.l.bf16 %v171_v24  ;;  %v627_v24 = vpop.permute.xlu2 %626  ;;  %v1511_v30 = vpop.permute.xlu0 %635 }
  0xc8   :  { %v641_v8 = vperm.slane %v1511_v30, %v1440_v9 }
  0xc9   :  { %v379_v45 = vadd.f32 %v363_v37, %v347_v33  ;;  %v645_v33 = vpop.permute.xlu1 %644 }
  0xca   :  { %v650_v11 = vperm.slane %v645_v33, %v1440_v9 }
  0xcb   :  { %v427_v57 = vmax.f32 %v379_v45, 0.0 }
  0xcc   :  { %v145_v36 = vpop.f32.mrf.mxu0 }
  0xcd   :  { %v172_v39 = vpack.c.bf16 %v145_v36, %v145_v36 }
  0xcf   :  { %v348_v46 = vunpack.c.l.bf16 %v172_v39  ;;  %v654_v27 = vpop.permute.xlu2 %653  ;;  %v1513_v34 = vpop.permute.xlu0 %662 }
  0xd0   :  { %v659_v0 = vperm.slane %v654_v27, %v1440_v9  ;;  %v1563_v27 = vunpack.c.l.bf16 %v650_v11 }
  0xd1   :  { %v380_v50 = vadd.f32 %v364_v41, %v348_v46  ;;  %v1515_v38 = vpop.permute.xlu1 %671 }
  0xd3   :  { %v428_v56 = vmax.f32 %v380_v50, 0.0 }
  0xd5   :  { %v439_v62 = vpack.c.bf16 %v428_v56, %v427_v57  ;;  %v749_v56 = vunpack.c.l.bf16 %v605_v35 }
  0xd7   :  { %510 = vmatpush.bf16.msra.mxu1 %v439_v62  ;;  %1197 = vmatpush.bf16.msra.mxu2 %v439_v62  ;;  %v681_v32 = vpop.permute.xlu2 %680  ;;  %v1519_v39 = vpop.permute.xlu0 %689  ;;  %v632_v62 = vperm.slane %v627_v24, %v1440_v9 }
  0xd8   :  { %v686_v61 = vperm.slane %v681_v32, %v1440_v9  ;;  %v753_v32 = vunpack.c.l.bf16 %v641_v8 }
  0xd9   :  { %v1521_v63 = vpop.permute.xlu1 %698 }
  0xda   :  { %v704_v33 = vperm.slane %v1521_v63, %v1440_v9 }
  0xdb   :  { %511 = vmatpush.bf16.msra.mxu1 %v438_v10  ;;  %1198 = vmatpush.bf16.msra.mxu2 %v438_v10  ;;  %v751_v10 = vunpack.c.l.bf16 %v623_v54 }
  0xdf   :  { %512 = vmatpush.bf16.msra.mxu1 %v437_v13  ;;  %1199 = vmatpush.bf16.msra.mxu2 %v437_v13  ;;  %v708_v37 = vpop.permute.xlu2 %707  ;;  %v1525_v5 = vpop.permute.xlu0 %716 }
  0xe0   :  { %v713_v12 = vperm.slane %v708_v37, %v1440_v9 }
  0xe1   :  { %v1529_v46 = vpop.permute.xlu1 %725 }
  0xe2   :  { %v1561_v26 = vunpack.c.l.bf16 %v713_v12 }
  0xe3   :  { %513 = vmatpush.bf16.msra.mxu1 %v436_v14  ;;  %1200 = vmatpush.bf16.msra.mxu2 %v436_v14 }
  0xe7   :  { %514 = vmatpush.bf16.msra.mxu1 %v1452_v31  ;;  %1201 = vmatpush.bf16.msra.mxu2 %v1452_v31  ;;  %v1191_v31 = vld [vmem:[%s1640_s3 + $0x30] sm:$0xff]  ;;  %v863_v41 = vpop.permute.xlu2 %862  ;;  %v1532_v49 = vpop.permute.xlu0 %871 }
  0xe8   :  { %v877_v51 = vperm.slane %v1532_v49, %v1440_v9  ;;  %v722_v49 = vperm.slane %v1525_v5, %v1440_v9 }
  0xe9   :  { %v1541_v3 = vpop.permute.xlu1 %880 }
  0xea   :  { %515 = vmatmul.bf16.vlgmr.msra.gmra.mxu1 %v1185_v15  ;;  %535 = vmatmul.bf16.vlgmr.msra.gmra.mxu2 %v1189_v16  ;;  %v752_v16 = vunpack.c.l.bf16 %v632_v62 }
  0xef   :  { %v890_v45 = vpop.permute.xlu2 %889  ;;  %v1557_v23 = vpop.permute.xlu0 %898 }
  0xf0   :  { %v895_v29 = vperm.slane %v890_v45, %v1440_v9 }
  0xf1   :  { %v908_v63 = vpop.permute.xlu1 %907 }
  0xf2   :  { %v1023_v45 = vunpack.c.l.bf16 %v895_v29 }
  0xf7   :  { %v917_v53 = vpop.permute.xlu2 %916  ;;  %v1590_v11 = vpop.permute.xlu0 %925 }
  0xf8   :  { %v922_v35 = vperm.slane %v917_v53, %v1440_v9 }
  0xfa   :  { %520 = vmatmul.bf16.gmra.mxu1 %v1186_v17  ;;  %540 = vmatmul.bf16.gmra.mxu2 %v1190_v18  ;;  %v1548_v17 = vunpack.c.l.bf16 %v659_v0  ;;  %v868_v18 = vperm.slane %v863_v41, %v1440_v9  ;;  %v1579_v0 = vunpack.c.l.bf16 %v922_v35 }
 0x10a   :  { %525 = vmatmul.bf16.gmra.mxu1 %v1187_v20  ;;  %545 = vmatmul.bf16.gmra.mxu2 %v1191_v31  ;;  %v1551_v31 = vunpack.c.l.bf16 %v686_v61  ;;  %v1021_v61 = vunpack.c.l.bf16 %v877_v51 }
 0x11a   :  { %530 = vmatmul.bf16.gmra.mxu1 %v1188_v21  ;;  %550 = vmatmul.bf16.gmra.mxu2 %v1192_v22  ;;  %v677_v21 = vperm.slane %v1515_v38, %v1440_v9  ;;  %v668_v22 = vperm.slane %v1513_v34, %v1440_v9  ;;  %v1020_v34 = vunpack.c.l.bf16 %v868_v18  ;;  %v1594_v18 = vunpack.c.l.bf16 %v722_v49 }
 0x167   :  { %v516_v36 = vpop.f32.mrf.mxu1 }
 0x168   :  { %v556_v48 = vpack.c.bf16 %v516_v36, %v516_v36 }
 0x16a   :  { %v732_v57 = vunpack.c.l.bf16 %v556_v48 }
 0x16c   :  { %v764_v13 = vadd.f32 %v748_v19, %v732_v57 }
 0x16d   :  { %v1517_v1 = vpop.f32.mrf.mxu2 }
 0x16e   :  { %v812_v30 = vmax.f32 %v764_v13, 0.0 }
 0x16f   :  { %v518_v40 = vpop.f32.mrf.mxu1 }
 0x170   :  { %v557_v47 = vpack.c.bf16 %v518_v40, %v518_v40  ;;  %v695_v40 = vperm.slane %v1519_v39, %v1440_v9  ;;  %v731_v39 = vperm.slane %v1529_v46, %v1440_v9  ;;  %v564_v46 = vpack.c.bf16 %v1517_v1, %v1517_v1 }
 0x171   :  { %v913_v1 = vperm.slane %v908_v63, %v1440_v9 }
 0x172   :  { %v733_v52 = vunpack.c.l.bf16 %v557_v47  ;;  %v756_v47 = vunpack.c.l.bf16 %v668_v22  ;;  %v759_v58 = vunpack.c.l.bf16 %v695_v40  ;;  %v1586_v12 = vunpack.c.l.bf16 %v731_v39 }
 0x174   :  { %v765_v6 = vadd.f32 %v749_v56, %v733_v52  ;;  %v828_v52 = vpack.c.bf16 %v812_v30, %v812_v30 }
 0x175   :  { %v1523_v42 = vpop.f32.mrf.mxu2 }
 0x176   :  { %v813_v20 = vmax.f32 %v765_v6, 0.0 }
 0x177   :  { %v521_v43 = vpop.f32.mrf.mxu1 }
 0x178   :  { %v558_v28 = vpack.c.bf16 %v521_v43, %v521_v43  ;;  %v829_v41 = vpack.c.bf16 %v813_v20, %v813_v20 }
 0x17a   :  { %v734_v7 = vunpack.c.l.bf16 %v558_v28  ;;  %v1573_v28 = vunpack.c.l.bf16 %v704_v33 }
 0x17c   :  { %v766_v24 = vadd.f32 %v750_v2, %v734_v7 }
 0x17d   :  { %v1527_v44 = vpop.f32.mrf.mxu2 }
 0x17e   :  { %v814_v48 = vmax.f32 %v766_v24, 0.0  ;;  %v740_v24 = vunpack.c.l.bf16 %v564_v46 }
 0x17f   :  { %v523_v4 = vpop.f32.mrf.mxu1 }
 0x180   :  { %v559_v50 = vpack.c.bf16 %v523_v4, %v523_v4  ;;  %v757_v4 = vunpack.c.l.bf16 %v677_v21  ;;  %v830_v53 = vpack.c.bf16 %v814_v48, %v814_v48  ;;  %v772_v51 = vadd.f32 %v756_v47, %v740_v24 }
 0x182   :  { %v735_v59 = vunpack.c.l.bf16 %v559_v50  ;;  %v944_v50 = vpop.permute.xlu2 %943  ;;  %v1006_v20 = vunpack.c.l.bf16 %v830_v53  ;;  %v931_v53 = vperm.slane %v1590_v11, %v1440_v9 }
 0x183   :  { %v949_v19 = vperm.slane %v944_v50, %v1440_v9 }
 0x184   :  { %v767_v14 = vadd.f32 %v751_v10, %v735_v59  ;;  %v1005_v59 = vunpack.c.l.bf16 %v829_v41  ;;  %v1004_v10 = vunpack.c.l.bf16 %v828_v52 }
 0x185   :  { %v1536_v55 = vpop.f32.mrf.mxu2 }
 0x186   :  { %v815_v36 = vmax.f32 %v767_v14, 0.0  ;;  %v1037_v8 = vmul.f32 %v1021_v61, %v1005_v59  ;;  %v1036_v22 = vmul.f32 %v1020_v34, %v1004_v10 }
 0x187   :  { %v526_v60 = vpop.f32.mrf.mxu1 }
 0x188   :  { %v560_v15 = vpack.c.bf16 %v526_v60, %v526_v60  ;;  %v831_v56 = vpack.c.bf16 %v815_v36, %v815_v36  ;;  %v565_v60 = vpack.c.bf16 %v1523_v42, %v1523_v42  ;;  %v886_v42 = vperm.slane %v1541_v3, %v1440_v9 }
 0x189   :  { %v566_v3 = vpack.c.bf16 %v1527_v44, %v1527_v44  ;;  %v1025_v44 = vunpack.c.l.bf16 %v913_v1 }
 0x18a   :  { %v736_v37 = vunpack.c.l.bf16 %v560_v15  ;;  %v1007_v13 = vunpack.c.l.bf16 %v831_v56  ;;  %v741_v14 = vunpack.c.l.bf16 %v565_v60  ;;  %v567_v15 = vpack.c.bf16 %v1536_v55, %v1536_v55  ;;  %v935_v55 = vpop.permute.xlu1 %934 }
 0x18b   :  { %v1022_v30 = vunpack.c.l.bf16 %v886_v42  ;;  %v742_v63 = vunpack.c.l.bf16 %v566_v3  ;;  %v940_v52 = vperm.slane %v935_v55, %v1440_v9 }
 0x18c   :  { %v768_v57 = vadd.f32 %v752_v16, %v736_v37  ;;  %v1039_v33 = vmul.f32 %v1023_v45, %v1007_v13  ;;  %v1052_v37 = vpack.c.bf16 %v1037_v8, %v1036_v22  ;;  %v743_v40 = vunpack.c.l.bf16 %v567_v15  ;;  %v1613_v8 = vpop.permute.xlu2 %970 }
 0x18d   :  { %v1559_v25 = vpop.f32.mrf.mxu2  ;;  %v1038_v35 = vmul.f32 %v1022_v30, %v1006_v20  ;;  %v1028_v13 = vunpack.c.l.bf16 %v940_v52  ;;  %v1027_v20 = vunpack.c.l.bf16 %v931_v53 }
 0x18e   :  { %v816_v2 = vmax.f32 %v768_v57, 0.0  ;;  %v1060_v56 = vunpack.c.l.bf16 %v1052_v37  ;;  %v775_v59 = vadd.f32 %v759_v58, %v743_v40 }
 0x18f   :  { %v528_v38 = vpop.f32.mrf.mxu1 }
 0x190   :  { %v561_v43 = vpack.c.bf16 %v528_v38, %v528_v38  ;;  %v832_v36 = vpack.c.bf16 %v816_v2, %v816_v2  ;;  %v773_v38 = vadd.f32 %v757_v4, %v741_v14  ;;  %v823_v2 = vmax.f32 %v775_v59, 0.0 }
 0x192   :  { %v737_v54 = vunpack.c.l.bf16 %v561_v43  ;;  %v1601_v43 = vunpack.c.l.bf16 %v949_v19  ;;  %v1008_v4 = vunpack.c.l.bf16 %v832_v36  ;;  %v821_v57 = vmax.f32 %v773_v38, 0.0  ;;  %v962_v24 = vpop.permute.xlu1 %961 }
 0x194   :  { %v769_v62 = vadd.f32 %v753_v32, %v737_v54  ;;  %v904_v32 = vperm.slane %v1557_v23, %v1440_v9  ;;  %v568_v23 = vpack.c.bf16 %v1559_v25, %v1559_v25  ;;  %v1053_v54 = vpack.c.bf16 %v1039_v33, %v1038_v35 }
 0x195   :  { %v548_v6 = vpop.f32.mrf.mxu2  ;;  %v820_v25 = vmax.f32 %v772_v51, 0.0  ;;  %v837_v58 = vpack.c.bf16 %v821_v57, %v821_v57 }
 0x196   :  { %v817_v7 = vmax.f32 %v769_v62, 0.0  ;;  %v569_v41 = vpack.c.bf16 %v548_v6, %v548_v6  ;;  %v1024_v45 = vunpack.c.l.bf16 %v904_v32  ;;  %v1607_v62 = vpop.permute.xlu0 %952  ;;  %v774_v6 = vadd.f32 %v1551_v31, %v742_v63 }
 0x197   :  { %v531_v5 = vpop.f32.mrf.mxu1  ;;  %v744_v61 = vunpack.c.l.bf16 %v568_v23  ;;  %v1062_v10 = vunpack.c.l.bf16 %v1053_v54  ;;  %v836_v31 = vpack.c.bf16 %v820_v25, %v820_v25  ;;  %v1013_v33 = vunpack.c.l.bf16 %v837_v58 }
 0x198   :  { %v562_v16 = vpack.c.bf16 %v531_v5, %v531_v5  ;;  %v833_v21 = vpack.c.bf16 %v817_v7, %v817_v7  ;;  %v745_v60 = vunpack.c.l.bf16 %v569_v41  ;;  %v1040_v46 = vmul.f32 %v1024_v45, %v1008_v4 }
 0x199   :  { %v1012_v35 = vunpack.c.l.bf16 %v836_v31  ;;  %v958_v23 = vperm.slane %v1607_v62, %v1440_v9  ;;  %v1045_v45 = vmul.f32 %v1601_v43, %v1013_v33  ;;  %v976_v43 = vperm.slane %v1613_v8, %v1440_v9 }
 0x19a   :  { %v738_v29 = vunpack.c.l.bf16 %v562_v16  ;;  %v1009_v34 = vunpack.c.l.bf16 %v833_v21  ;;  %v777_v5 = vadd.f32 %v1561_v26, %v745_v60  ;;  %v822_v21 = vmax.f32 %v774_v6, 0.0 }
 0x19b   :  { %v839_v26 = vpack.c.bf16 %v823_v2, %v823_v2  ;;  %v1044_v60 = vmul.f32 %v1028_v13, %v1012_v35  ;;  %v1030_v62 = vunpack.c.l.bf16 %v958_v23 }
 0x19c   :  { %v770_v48 = vadd.f32 %v1563_v27, %v738_v29  ;;  %v1061_v27 = vunpack.c.h.bf16 %v1052_v37  ;;  %v1041_v49 = vmul.f32 %v1025_v44, %v1009_v34  ;;  %v776_v29 = vadd.f32 %v1573_v28, %v744_v61  ;;  %v989_v61 = vpop.permute.xlu1 %988 }
 0x19d   :  { %v551_v50 = vpop.f32.mrf.mxu2  ;;  %v825_v36 = vmax.f32 %v777_v5, 0.0  ;;  %v1063_v37 = vunpack.c.h.bf16 %v1053_v54  ;;  %v838_v34 = vpack.c.bf16 %v822_v21, %v822_v21  ;;  %v1015_v52 = vunpack.c.l.bf16 %v839_v26 }
 0x19e   :  { %v818_v19 = vmax.f32 %v770_v48, 0.0  ;;  %v570_v7 = vpack.c.bf16 %v551_v50, %v551_v50  ;;  %v1076_v14 = vadd.f32 %v1061_v27, %v1060_v56  ;;  %v1054_v15 = vpack.c.bf16 %v1041_v49, %v1040_v46  ;;  %v980_v50 = vpop.permute.xlu0 %979  ;;  %v998_v49 = vpop.permute.xlu2 %997 }
 0x19f   :  { %v533_v39 = vpop.f32.mrf.mxu1  ;;  %v824_v51 = vmax.f32 %v776_v29, 0.0  ;;  %v841_v54 = vpack.c.bf16 %v825_v36, %v825_v36  ;;  %v1014_v27 = vunpack.c.l.bf16 %v838_v34  ;;  %v1056_v25 = vpack.c.bf16 %v1045_v45, %v1044_v60 }
 0x1a0   :  { %v563_v47 = vpack.c.bf16 %v533_v39, %v533_v39  ;;  %v834_v16 = vpack.c.bf16 %v818_v19, %v818_v19  ;;  %v1077_v3 = vadd.f32 %v1076_v14, %v1062_v10  ;;  %v746_v30 = vunpack.c.l.bf16 %v570_v7 }
 0x1a1   :  { %v1064_v38 = vunpack.c.l.bf16 %v1054_v15  ;;  %v1065_v19 = vunpack.c.h.bf16 %v1054_v15  ;;  %v1017_v10 = vunpack.c.l.bf16 %v841_v54  ;;  %v1046_v58 = vmul.f32 %v1030_v62, %v1014_v27 }
 0x1a2   :  { %v739_v42 = vunpack.c.l.bf16 %v563_v47  ;;  %v1010_v40 = vunpack.c.l.bf16 %v834_v16  ;;  %v1078_v44 = vadd.f32 %v1077_v3, %v1063_v37  ;;  %v778_v28 = vadd.f32 %v1594_v18, %v746_v30 }
 0x1a3   :  { %v840_v18 = vpack.c.bf16 %v824_v51, %v824_v51  ;;  %v1032_v16 = vunpack.c.l.bf16 %v976_v43  ;;  %v1068_v8 = vunpack.c.l.bf16 %v1056_v25 }
 0x1a4   :  { %v771_v11 = vadd.f32 %v1548_v17, %v739_v42  ;;  %v967_v17 = vperm.slane %v962_v24, %v1440_v9  ;;  %v1079_v4 = vadd.f32 %v1078_v44, %v1064_v38  ;;  %v1042_v39 = vmul.f32 %v1579_v0, %v1010_v40 }
 0x1a5   :  { %v553_v1 = vpop.f32.mrf.mxu2  ;;  %v826_v47 = vmax.f32 %v778_v28, 0.0  ;;  %v1003_v42 = vperm.slane %v998_v49, %v1440_v9  ;;  %v1016_v2 = vunpack.c.l.bf16 %v840_v18  ;;  %v1069_v24 = vunpack.c.h.bf16 %v1056_v25 }
 0x1a6   :  { %v571_v22 = vpack.c.bf16 %v553_v1, %v553_v1  ;;  %v819_v32 = vmax.f32 %v771_v11, 0.0  ;;  %v1031_v59 = vunpack.c.l.bf16 %v967_v17  ;;  %v1080_v0 = vadd.f32 %v1079_v4, %v1065_v19 }
 0x1a7   :  { %v842_v5 = vpack.c.bf16 %v826_v47, %v826_v47  ;;  %v994_v11 = vperm.slane %v989_v61, %v1440_v9  ;;  %v1048_v3 = vmul.f32 %v1032_v16, %v1016_v2  ;;  %v1098_v4 = vstv %s1641_s6 }
 0x1a8   :  { %v747_v55 = vunpack.c.l.bf16 %v571_v22  ;;  %v835_v41 = vpack.c.bf16 %v819_v32, %v819_v32  ;;  %v1047_v6 = vmul.f32 %v1031_v59, %v1015_v52  ;;  %v1035_v22 = vunpack.c.l.bf16 %v1003_v42 }
 0x1a9   :  { %v1018_v29 = vunpack.c.l.bf16 %v842_v5  ;;  %v1034_v32 = vunpack.c.l.bf16 %v994_v11 }
 0x1aa   :  { %v779_v48 = vadd.f32 %v1586_v12, %v747_v55  ;;  %v1011_v63 = vunpack.c.l.bf16 %v835_v41  ;;  %v985_v12 = vperm.slane %v980_v50, %v1440_v9  ;;  %v1057_v1 = vpack.c.bf16 %v1047_v6, %v1046_v58 }
 0x1ab   :  { %v1050_v38 = vmul.f32 %v1034_v32, %v1018_v29 }
 0x1ac   :  { %v1043_v56 = vmul.f32 %v1027_v20, %v1011_v63  ;;  %v827_v57 = vmax.f32 %v779_v48, 0.0  ;;  %v1033_v13 = vunpack.c.l.bf16 %v985_v12  ;;  %v1070_v33 = vunpack.c.l.bf16 %v1057_v1 }
 0x1ad   :  { %v1071_v37 = vunpack.c.h.bf16 %v1057_v1 }
 0x1ae   :  { %v1055_v53 = vpack.c.bf16 %v1043_v56, %v1042_v39  ;;  %v843_v7 = vpack.c.bf16 %v827_v57, %v827_v57  ;;  %v1049_v20 = vmul.f32 %v1033_v13, %v1017_v10 }
 0x1b0   :  { %v1066_v46 = vunpack.c.l.bf16 %v1055_v53  ;;  %v1067_v14 = vunpack.c.h.bf16 %v1055_v53  ;;  %v1019_v21 = vunpack.c.l.bf16 %v843_v7  ;;  %v1058_v26 = vpack.c.bf16 %v1049_v20, %v1048_v3 }
 0x1b2   :  { %v1081_v15 = vadd.f32 %v1080_v0, %v1066_v46  ;;  %v1051_v55 = vmul.f32 %v1035_v22, %v1019_v21  ;;  %v1072_v41 = vunpack.c.l.bf16 %v1058_v26  ;;  %v1073_v35 = vunpack.c.h.bf16 %v1058_v26 }
 0x1b4   :  { %v1082_v31 = vadd.f32 %v1081_v15, %v1067_v14  ;;  %v1059_v9 = vpack.c.bf16 %v1051_v55, %v1050_v38 }
 0x1b6   :  { %v1083_v30 = vadd.f32 %v1082_v31, %v1068_v8  ;;  %v1074_v48 = vunpack.c.l.bf16 %v1059_v9  ;;  %v1075_v44 = vunpack.c.h.bf16 %v1059_v9 }
 0x1b8   :  { %v1084_v36 = vadd.f32 %v1083_v30, %v1069_v24 }
 0x1ba   :  { %v1085_v40 = vadd.f32 %v1084_v36, %v1070_v33 }
 0x1bc   :  { %v1086_v17 = vadd.f32 %v1085_v40, %v1071_v37 }
 0x1be   :  { %v1087_v34 = vadd.f32 %v1086_v17, %v1072_v41 }
 0x1c0   :  { %v1088_v50 = vadd.f32 %v1087_v34, %v1073_v35 }
 0x1c2   :  { %v1089_v51 = vadd.f32 %v1088_v50, %v1074_v48 }
 0x1c4   :  { %v1090_v28 = vadd.f32 %v1089_v51, %v1075_v44 }
 0x1c6   :  { %v1091_v63 = vrot.slane %v1090_v28, 4 }
 0x1c8   :  { %v1092_v23 = vadd.f32 %v1091_v63, %v1090_v28 }
 0x1ca   :  { %v1093_v45 = vrot.slane %v1092_v23, 2 }
 0x1cc   :  { %v1094_v52 = vadd.f32 %v1093_v45, %v1092_v23 }
 0x1ce   :  { %v1095_v54 = vrot.slane %v1094_v52, 1 }
 0x1d0   :  { %v1096_v39 = vadd.f32 %v1095_v54, %v1094_v52 }
 0x1d2   :  { %v1099_v56 = vadd.f32 %v1098_v4, %v1096_v39 }
 0x1d4   :  { %1100 = vst [vmem:[%s1642_s7] sm:$0x1] %v1099_v56 }

</bundles_post_ra>
